<compile_context>
chip_gen: v6e
topology: v6e:2x2x1
jax: 0.10.0
libtpu: 0.0.40
codegen_flags: <defaults>
</compile_context>

<pallas_src>
import jax
import jax.numpy as jnp
from jax.experimental import pallas as pl
from jax.experimental.pallas import tpu as pltpu

# module-level dims (the PyTorch file uses globals object_dim / resnet_dim)
OBJECT_DIM = 32
RESNET_DIM = 32  # must equal OBJECT_DIM for torch.stack in the reference code


def attention_kernel(params_ref, feat_ref, vid_ref, attn_ref):
    # params_ref: (3, L) rows = [ [a2|a2|a1*O],  a2 tiled,  a3 tiled ]
    # feat_ref  : (VB, F, L) lane-dense  [res(D) | opt(D) | obj_0..obj_{O-1}]
    # vid_ref   : (VB, F, D)       attn_ref: (VB, F, O+4)
    feat = feat_ref[...].astype(jnp.float32)
    D = vid_ref.shape[-1]
    L = feat.shape[-1]
    O = L // D - 2

    p_mix = params_ref[0:1, :]          # (1, L)  [a2 | a2 | a1 x O]
    a2 = params_ref[1:2, 0:D]           # (1, D)
    a3 = params_ref[2:3, 0:D]           # (1, D)

    # single full-width multiply -> every "feature . param" first-pass score
    prod = feat * p_mix                 # (VB, F, L)

    def seg(x, i):                      # static D-lane segment i of the slab
        return x[:, :, i * D:(i + 1) * D]

    def seg_sum(i):                     # (VB, F, 1)
        return jnp.sum(seg(prod, i), axis=-1, keepdims=True)

    sr = seg_sum(0)                                                   # a2 . resnet
    so = seg_sum(1)                                                   # a2 . optical
    s1 = jnp.concatenate([seg_sum(2 + o) for o in range(O)], axis=-1)  # (VB,F,O)

    # ---- stage 1: softmax over objects (one packed exp, exact normalize) ----
    e1 = jnp.exp(s1 - jnp.max(s1, axis=-1, keepdims=True))
    attn1 = e1 / jnp.sum(e1, axis=-1, keepdims=True)                  # (VB,F,O)
    obj_att = attn1[:, :, 0:1] * seg(feat, 2)
    for o in range(1, O):
        obj_att = obj_att + attn1[:, :, o:o + 1] * seg(feat, 2 + o)   # (VB,F,D)

    # ---- stage 2: softmax over (resnet, optical, object_attended) ----
    sb = jnp.sum(obj_att * a2, axis=-1, keepdims=True)                # (VB,F,1)
    s2 = jnp.concatenate([sr, so, sb], axis=-1)                       # (VB,F,3)
    e2 = jnp.exp(s2 - jnp.max(s2, axis=-1, keepdims=True))
    attn2 = e2 / jnp.sum(e2, axis=-1, keepdims=True)                  # (VB,F,3)
    comb = (attn2[:, :, 0:1] * seg(feat, 0)
            + attn2[:, :, 1:2] * seg(feat, 1)
            + attn2[:, :, 2:3] * obj_att)                             # (VB,F,D)

    # ---- stage 3: softmax over frames (per video) ----
    s3 = jnp.sum(comb * a3, axis=-1, keepdims=True)                   # (VB,F,1)
    e3 = jnp.exp(s3 - jnp.max(s3, axis=1, keepdims=True))
    attn3 = e3 / jnp.sum(e3, axis=1, keepdims=True)                   # (VB,F,1)

    # two stores per tile: vid, and the packed attention weights
    vid_ref[...] = (attn3 * comb).astype(vid_ref.dtype)
    attn_ref[...] = jnp.concatenate([attn1, attn2, attn3],
                                    axis=-1).astype(attn_ref.dtype)   # (VB,F,O+4)


def _choose_block_videos(num_videos, num_frames, *, vmem_budget_bytes=24 << 20):
    """Byte-budgeted videos-per-grid-step.

    Per-video VMEM estimate (f32, lanes padded to 128 in VMEM):
      2x double-buffered feature tile (192 -> 256 lanes), 2x double-buffered
      output tiles (32 -> 128 and 8 -> 128 lanes), plus ~6 live 256-lane f32
      compiler temporaries (feat, prod, obj_att, comb, ...).
    Budget defaults to 24 MiB so it fits v7x's 32 MiB default scoped VMEM.
    """
    per_video = max(1, num_frames * 4 * (2 * 256 + 2 * 128 + 2 * 128 + 6 * 256))
    vb_mem = max(1, vmem_budget_bytes // per_video)
    if vb_mem < num_videos:
        return int(vb_mem)            # VMEM-limited: already >= 2 grid steps
    # Whole batch fits in budget: still split into a few steps so both v7x
    # TensorCores get work and step i+1's DMA can hide behind step i's compute.
    target_steps = 2 if num_videos < 64 else 8
    return max(1, -(-num_videos // target_steps))


def attention_forward(resnet_ftrs, optical_ftrs, object_ftrs,
                      attn1_p, attn2_p, attn3_p, *,
                      feature_dtype=jnp.float32,
                      vmem_budget_bytes=24 << 20):
    V, F_, O, D = object_ftrs.shape
    assert resnet_ftrs.shape == (V, F_, D)
    assert optical_ftrs.shape == (V, F_, D)
    assert D == OBJECT_DIM and RESNET_DIM == OBJECT_DIM
    L = (O + 2) * D

    # One lane-dense feature slab [res | opt | obj_0 .. obj_{O-1}] = single
    # input DMA stream.  On v5e/v6e pass feature_dtype=jnp.bfloat16 to halve
    # HBM read traffic when upstream precision allows (kernel math stays f32).
    feat = jnp.concatenate(
        [resnet_ftrs.astype(feature_dtype),
         optical_ftrs.astype(feature_dtype),
         object_ftrs.reshape(V, F_, O * D).astype(feature_dtype)], axis=-1)

    # Merged, pre-tiled parameter block (one tiny grid-invariant DMA).
    a1 = attn1_p.astype(jnp.float32)
    a2 = attn2_p.astype(jnp.float32)
    a3 = attn3_p.astype(jnp.float32)
    p_mix = jnp.concatenate([a2, a2] + [a1] * O, axis=0)               # (L,)
    params = jnp.stack([p_mix, jnp.tile(a2, O + 2), jnp.tile(a3, O + 2)], axis=0)

    # Byte-budgeted video block; pad V up instead of shrinking VB toward 1.
    VB = _choose_block_videos(V, F_, vmem_budget_bytes=vmem_budget_bytes)
    steps = -(-V // VB)
    Vp = steps * VB
    if Vp != V:
        feat = jnp.concatenate(
            [feat, jnp.zeros((Vp - V, F_, L), feat.dtype)], axis=0)

    NA = O + 3 + 1   # packed attention lanes: attn1(O) | attn2(3) | attn3(1)

    vid, attns = pl.pallas_call(
        attention_kernel,
        out_shape=(jax.ShapeDtypeStruct((Vp, F_, D), jnp.float32),
                   jax.ShapeDtypeStruct((Vp, F_, NA), jnp.float32)),
        grid=(steps,),
        in_specs=[
            pl.BlockSpec((3, L), lambda v: (0, 0)),         # merged params
            pl.BlockSpec((VB, F_, L), lambda v: (v, 0, 0)),  # packed features
        ],
        out_specs=(
            pl.BlockSpec((VB, F_, D), lambda v: (v, 0, 0)),   # video_attended
            pl.BlockSpec((VB, F_, NA), lambda v: (v, 0, 0)),  # packed attn wts
        ),
        compiler_params=pltpu.CompilerParams(
            dimension_semantics=("parallel",),
            vmem_limit_bytes=32 << 20),
    )(params, feat)

    vid = vid[:V]
    attns = attns[:V]
    return (vid,
            attns[..., :O],                 # attn1  (V, F, O)
            attns[..., O:O + 3],            # attn2  (V, F, 3)
            attns[..., O + 3:O + 4])        # attn3  (V, F, 1)


def attention_reference(resnet_ftrs, optical_ftrs, object_ftrs, a1, a2, a3):
    """Pure-JAX reference mirroring the PyTorch forward exactly."""
    s1 = jnp.einsum('vfod,d->vfo', object_ftrs, a1)
    attn1 = jax.nn.softmax(s1, axis=2)
    obj_att = jnp.einsum('vfo,vfod->vfd', attn1, object_ftrs)
    combine = jnp.stack((resnet_ftrs, optical_ftrs, obj_att), axis=2)  # (V,F,3,D)
    s2 = jnp.einsum('vfkd,d->vfk', combine, a2)
    attn2 = jax.nn.softmax(s2, axis=2)
    comb_att = jnp.einsum('vfk,vfkd->vfd', attn2, combine)
    s3 = jnp.einsum('vfd,d->vf', comb_att, a3)[..., None]              # (V,F,1)
    attn3 = jax.nn.softmax(s3, axis=1)
    vid = attn3 * comb_att
    return vid, attn1, attn2, attn3


if __name__ == "__main__":
    V, F_, O, D = 8, 8, 4, OBJECT_DIM

    key = jax.random.PRNGKey(0)
    k1, k2, k3, k4, k5, k6 = jax.random.split(key, 6)

    resnet_ftrs = jax.random.normal(k1, (V, F_, RESNET_DIM), dtype=jnp.float32)
    optical_ftrs = jax.random.normal(k2, (V, F_, RESNET_DIM), dtype=jnp.float32)
    object_ftrs = jax.random.normal(k3, (V, F_, O, D), dtype=jnp.float32)

    # torch.rand(dim) -> uniform [0, 1)
    attn1_p = jax.random.uniform(k4, (OBJECT_DIM,), dtype=jnp.float32)
    attn2_p = jax.random.uniform(k5, (RESNET_DIM,), dtype=jnp.float32)
    attn3_p = jax.random.uniform(k6, (RESNET_DIM,), dtype=jnp.float32)

    outs = jax.jit(attention_forward)(resnet_ftrs, optical_ftrs, object_ftrs,
                                      attn1_p, attn2_p, attn3_p)
    outs = jax.block_until_ready(outs)

    refs = attention_reference(resnet_ftrs, optical_ftrs, object_ftrs,
                               attn1_p, attn2_p, attn3_p)
    for got, exp in zip(outs, refs):
        assert got.shape == exp.shape, (got.shape, exp.shape)
        assert jnp.allclose(got, exp, atol=1e-4, rtol=1e-4), "mismatch vs reference"

    print("KERNEL_OK")
</pallas_src>

<mosaic_0001>
module attributes {stable_mosaic.version = 11 : i64} {
  func.func @attention_kernel(%arg0: i32, %arg1: memref<3x192xf32, #tpu.memory_space<vmem>>, %arg2: memref<4x8x192xf32, #tpu.memory_space<vmem>>, %arg3: memref<4x8x32xf32, #tpu.memory_space<vmem>>, %arg4: memref<4x8x8xf32, #tpu.memory_space<vmem>>) attributes {dimension_semantics = [#tpu.dimension_semantics<parallel>], iteration_bounds = array<i64: 2>, scalar_prefetch = 0 : i64, scratch_operands = 0 : i64, tpu.core_type = #tpu.core_type<tc>, window_params = [{pipeline_mode = #tpu.pipeline_mode<synchronous>, transform_indices = @transform_0, window_bounds = array<i64: 3, 192>}, {transform_indices = @transform_1, window_bounds = array<i64: 4, 8, 192>}, {transform_indices = @transform_2, window_bounds = array<i64: 4, 8, 32>}, {transform_indices = @transform_3, window_bounds = array<i64: 4, 8, 8>}]} {
    %c0 = arith.constant 0 : index
    %c0_0 = arith.constant 0 : index
    %c0_1 = arith.constant 0 : index
    %0 = vector.load %arg2[%c0, %c0_0, %c0_1] : memref<4x8x192xf32, #tpu.memory_space<vmem>>, vector<4x8x192xf32>
    %c0_2 = arith.constant 0 : index
    %c0_3 = arith.constant 0 : index
    %1 = vector.load %arg1[%c0_2, %c0_3] : memref<3x192xf32, #tpu.memory_space<vmem>>, vector<1x192xf32>
    %c1 = arith.constant 1 : index
    %c0_4 = arith.constant 0 : index
    %2 = vector.load %arg1[%c1, %c0_4] : memref<3x192xf32, #tpu.memory_space<vmem>>, vector<1x32xf32>
    %c2 = arith.constant 2 : index
    %c0_5 = arith.constant 0 : index
    %3 = vector.load %arg1[%c2, %c0_5] : memref<3x192xf32, #tpu.memory_space<vmem>>, vector<1x32xf32>
    %4 = vector.shape_cast %1 : vector<1x192xf32> to vector<1x1x192xf32>
    %5 = vector.broadcast %4 : vector<1x1x192xf32> to vector<4x8x192xf32>
    %6 = arith.mulf %0, %5 : vector<4x8x192xf32>
    %7 = vector.extract_strided_slice %6 {offsets = [0, 0, 0], sizes = [4, 8, 32], strides = [1, 1, 1]} : vector<4x8x192xf32> to vector<4x8x32xf32>
    %cst = arith.constant dense<0.000000e+00> : vector<4x8xf32>
    %8 = vector.multi_reduction <add>, %7, %cst [2] : vector<4x8x32xf32> to vector<4x8xf32>
    %9 = vector.shape_cast %8 : vector<4x8xf32> to vector<4x8x1xf32>
    %10 = vector.extract_strided_slice %6 {offsets = [0, 0, 32], sizes = [4, 8, 32], strides = [1, 1, 1]} : vector<4x8x192xf32> to vector<4x8x32xf32>
    %cst_6 = arith.constant dense<0.000000e+00> : vector<4x8xf32>
    %11 = vector.multi_reduction <add>, %10, %cst_6 [2] : vector<4x8x32xf32> to vector<4x8xf32>
    %12 = vector.shape_cast %11 : vector<4x8xf32> to vector<4x8x1xf32>
    %13 = vector.extract_strided_slice %6 {offsets = [0, 0, 64], sizes = [4, 8, 32], strides = [1, 1, 1]} : vector<4x8x192xf32> to vector<4x8x32xf32>
    %cst_7 = arith.constant dense<0.000000e+00> : vector<4x8xf32>
    %14 = vector.multi_reduction <add>, %13, %cst_7 [2] : vector<4x8x32xf32> to vector<4x8xf32>
    %15 = vector.shape_cast %14 : vector<4x8xf32> to vector<4x8x1xf32>
    %16 = vector.extract_strided_slice %6 {offsets = [0, 0, 96], sizes = [4, 8, 32], strides = [1, 1, 1]} : vector<4x8x192xf32> to vector<4x8x32xf32>
    %cst_8 = arith.constant dense<0.000000e+00> : vector<4x8xf32>
    %17 = vector.multi_reduction <add>, %16, %cst_8 [2] : vector<4x8x32xf32> to vector<4x8xf32>
    %18 = vector.shape_cast %17 : vector<4x8xf32> to vector<4x8x1xf32>
    %19 = vector.extract_strided_slice %6 {offsets = [0, 0, 128], sizes = [4, 8, 32], strides = [1, 1, 1]} : vector<4x8x192xf32> to vector<4x8x32xf32>
    %cst_9 = arith.constant dense<0.000000e+00> : vector<4x8xf32>
    %20 = vector.multi_reduction <add>, %19, %cst_9 [2] : vector<4x8x32xf32> to vector<4x8xf32>
    %21 = vector.shape_cast %20 : vector<4x8xf32> to vector<4x8x1xf32>
    %22 = vector.extract_strided_slice %6 {offsets = [0, 0, 160], sizes = [4, 8, 32], strides = [1, 1, 1]} : vector<4x8x192xf32> to vector<4x8x32xf32>
    %cst_10 = arith.constant dense<0.000000e+00> : vector<4x8xf32>
    %23 = vector.multi_reduction <add>, %22, %cst_10 [2] : vector<4x8x32xf32> to vector<4x8xf32>
    %24 = vector.shape_cast %23 : vector<4x8xf32> to vector<4x8x1xf32>
    %25 = tpu.concatenate %15, %18, %21, %24 in 2 : vector<4x8x1xf32>, vector<4x8x1xf32>, vector<4x8x1xf32>, vector<4x8x1xf32> -> vector<4x8x4xf32>
    %cst_11 = arith.constant dense<0xFF800000> : vector<4x8xf32>
    %26 = vector.multi_reduction <maximumf>, %25, %cst_11 [2] : vector<4x8x4xf32> to vector<4x8xf32>
    %27 = vector.shape_cast %26 : vector<4x8xf32> to vector<4x8x1xf32>
    %28 = vector.broadcast %27 : vector<4x8x1xf32> to vector<4x8x4xf32>
    %29 = arith.subf %25, %28 : vector<4x8x4xf32>
    %30 = math.exp %29 : vector<4x8x4xf32>
    %cst_12 = arith.constant dense<0.000000e+00> : vector<4x8xf32>
    %31 = vector.multi_reduction <add>, %30, %cst_12 [2] : vector<4x8x4xf32> to vector<4x8xf32>
    %32 = vector.shape_cast %31 : vector<4x8xf32> to vector<4x8x1xf32>
    %33 = vector.broadcast %32 : vector<4x8x1xf32> to vector<4x8x4xf32>
    %34 = arith.divf %30, %33 : vector<4x8x4xf32>
    %35 = vector.extract_strided_slice %34 {offsets = [0, 0, 0], sizes = [4, 8, 1], strides = [1, 1, 1]} : vector<4x8x4xf32> to vector<4x8x1xf32>
    %36 = vector.extract_strided_slice %0 {offsets = [0, 0, 64], sizes = [4, 8, 32], strides = [1, 1, 1]} : vector<4x8x192xf32> to vector<4x8x32xf32>
    %37 = vector.broadcast %35 : vector<4x8x1xf32> to vector<4x8x32xf32>
    %38 = arith.mulf %37, %36 : vector<4x8x32xf32>
    %39 = vector.extract_strided_slice %34 {offsets = [0, 0, 1], sizes = [4, 8, 1], strides = [1, 1, 1]} : vector<4x8x4xf32> to vector<4x8x1xf32>
    %40 = vector.extract_strided_slice %0 {offsets = [0, 0, 96], sizes = [4, 8, 32], strides = [1, 1, 1]} : vector<4x8x192xf32> to vector<4x8x32xf32>
    %41 = vector.broadcast %39 : vector<4x8x1xf32> to vector<4x8x32xf32>
    %42 = arith.mulf %41, %40 : vector<4x8x32xf32>
    %43 = arith.addf %38, %42 : vector<4x8x32xf32>
    %44 = vector.extract_strided_slice %34 {offsets = [0, 0, 2], sizes = [4, 8, 1], strides = [1, 1, 1]} : vector<4x8x4xf32> to vector<4x8x1xf32>
    %45 = vector.extract_strided_slice %0 {offsets = [0, 0, 128], sizes = [4, 8, 32], strides = [1, 1, 1]} : vector<4x8x192xf32> to vector<4x8x32xf32>
    %46 = vector.broadcast %44 : vector<4x8x1xf32> to vector<4x8x32xf32>
    %47 = arith.mulf %46, %45 : vector<4x8x32xf32>
    %48 = arith.addf %43, %47 : vector<4x8x32xf32>
    %49 = vector.extract_strided_slice %34 {offsets = [0, 0, 3], sizes = [4, 8, 1], strides = [1, 1, 1]} : vector<4x8x4xf32> to vector<4x8x1xf32>
    %50 = vector.extract_strided_slice %0 {offsets = [0, 0, 160], sizes = [4, 8, 32], strides = [1, 1, 1]} : vector<4x8x192xf32> to vector<4x8x32xf32>
    %51 = vector.broadcast %49 : vector<4x8x1xf32> to vector<4x8x32xf32>
    %52 = arith.mulf %51, %50 : vector<4x8x32xf32>
    %53 = arith.addf %48, %52 : vector<4x8x32xf32>
    %54 = vector.shape_cast %2 : vector<1x32xf32> to vector<1x1x32xf32>
    %55 = vector.broadcast %54 : vector<1x1x32xf32> to vector<4x8x32xf32>
    %56 = arith.mulf %53, %55 : vector<4x8x32xf32>
    %cst_13 = arith.constant dense<0.000000e+00> : vector<4x8xf32>
    %57 = vector.multi_reduction <add>, %56, %cst_13 [2] : vector<4x8x32xf32> to vector<4x8xf32>
    %58 = vector.shape_cast %57 : vector<4x8xf32> to vector<4x8x1xf32>
    %59 = tpu.concatenate %9, %12, %58 in 2 : vector<4x8x1xf32>, vector<4x8x1xf32>, vector<4x8x1xf32> -> vector<4x8x3xf32>
    %cst_14 = arith.constant dense<0xFF800000> : vector<4x8xf32>
    %60 = vector.multi_reduction <maximumf>, %59, %cst_14 [2] : vector<4x8x3xf32> to vector<4x8xf32>
    %61 = vector.shape_cast %60 : vector<4x8xf32> to vector<4x8x1xf32>
    %62 = vector.broadcast %61 : vector<4x8x1xf32> to vector<4x8x3xf32>
    %63 = arith.subf %59, %62 : vector<4x8x3xf32>
    %64 = math.exp %63 : vector<4x8x3xf32>
    %cst_15 = arith.constant dense<0.000000e+00> : vector<4x8xf32>
    %65 = vector.multi_reduction <add>, %64, %cst_15 [2] : vector<4x8x3xf32> to vector<4x8xf32>
    %66 = vector.shape_cast %65 : vector<4x8xf32> to vector<4x8x1xf32>
    %67 = vector.broadcast %66 : vector<4x8x1xf32> to vector<4x8x3xf32>
    %68 = arith.divf %64, %67 : vector<4x8x3xf32>
    %69 = vector.extract_strided_slice %68 {offsets = [0, 0, 0], sizes = [4, 8, 1], strides = [1, 1, 1]} : vector<4x8x3xf32> to vector<4x8x1xf32>
    %70 = vector.extract_strided_slice %0 {offsets = [0, 0, 0], sizes = [4, 8, 32], strides = [1, 1, 1]} : vector<4x8x192xf32> to vector<4x8x32xf32>
    %71 = vector.broadcast %69 : vector<4x8x1xf32> to vector<4x8x32xf32>
    %72 = arith.mulf %71, %70 : vector<4x8x32xf32>
    %73 = vector.extract_strided_slice %68 {offsets = [0, 0, 1], sizes = [4, 8, 1], strides = [1, 1, 1]} : vector<4x8x3xf32> to vector<4x8x1xf32>
    %74 = vector.extract_strided_slice %0 {offsets = [0, 0, 32], sizes = [4, 8, 32], strides = [1, 1, 1]} : vector<4x8x192xf32> to vector<4x8x32xf32>
    %75 = vector.broadcast %73 : vector<4x8x1xf32> to vector<4x8x32xf32>
    %76 = arith.mulf %75, %74 : vector<4x8x32xf32>
    %77 = arith.addf %72, %76 : vector<4x8x32xf32>
    %78 = vector.extract_strided_slice %68 {offsets = [0, 0, 2], sizes = [4, 8, 1], strides = [1, 1, 1]} : vector<4x8x3xf32> to vector<4x8x1xf32>
    %79 = vector.broadcast %78 : vector<4x8x1xf32> to vector<4x8x32xf32>
    %80 = arith.mulf %79, %53 : vector<4x8x32xf32>
    %81 = arith.addf %77, %80 : vector<4x8x32xf32>
    %82 = vector.shape_cast %3 : vector<1x32xf32> to vector<1x1x32xf32>
    %83 = vector.broadcast %82 : vector<1x1x32xf32> to vector<4x8x32xf32>
    %84 = arith.mulf %81, %83 : vector<4x8x32xf32>
    %cst_16 = arith.constant dense<0.000000e+00> : vector<4x8xf32>
    %85 = vector.multi_reduction <add>, %84, %cst_16 [2] : vector<4x8x32xf32> to vector<4x8xf32>
    %86 = vector.shape_cast %85 : vector<4x8xf32> to vector<4x8x1xf32>
    %cst_17 = arith.constant dense<0xFF800000> : vector<4x1xf32>
    %87 = vector.multi_reduction <maximumf>, %86, %cst_17 [1] : vector<4x8x1xf32> to vector<4x1xf32>
    %88 = vector.shape_cast %87 : vector<4x1xf32> to vector<4x1x1xf32>
    %89 = vector.broadcast %88 : vector<4x1x1xf32> to vector<4x8x1xf32>
    %90 = arith.subf %86, %89 : vector<4x8x1xf32>
    %91 = math.exp %90 : vector<4x8x1xf32>
    %cst_18 = arith.constant dense<0.000000e+00> : vector<4x1xf32>
    %92 = vector.multi_reduction <add>, %91, %cst_18 [1] : vector<4x8x1xf32> to vector<4x1xf32>
    %93 = vector.shape_cast %92 : vector<4x1xf32> to vector<4x1x1xf32>
    %94 = vector.broadcast %93 : vector<4x1x1xf32> to vector<4x8x1xf32>
    %95 = arith.divf %91, %94 : vector<4x8x1xf32>
    %96 = vector.broadcast %95 : vector<4x8x1xf32> to vector<4x8x32xf32>
    %97 = arith.mulf %96, %81 : vector<4x8x32xf32>
    %c0_19 = arith.constant 0 : index
    %c0_20 = arith.constant 0 : index
    %c0_21 = arith.constant 0 : index
    %98 = vector.load %arg3[%c0_19, %c0_20, %c0_21] : memref<4x8x32xf32, #tpu.memory_space<vmem>>, vector<4x8x32xf32>
    tpu.vector_store %arg3[%c0_19, %c0_20, %c0_21], %97 {strides = array<i32>} : memref<4x8x32xf32, #tpu.memory_space<vmem>>, vector<4x8x32xf32>,
    %99 = tpu.concatenate %34, %68, %95 in 2 : vector<4x8x4xf32>, vector<4x8x3xf32>, vector<4x8x1xf32> -> vector<4x8x8xf32>
    %c0_22 = arith.constant 0 : index
    %c0_23 = arith.constant 0 : index
    %c0_24 = arith.constant 0 : index
    %100 = vector.load %arg4[%c0_22, %c0_23, %c0_24] : memref<4x8x8xf32, #tpu.memory_space<vmem>>, vector<4x8x8xf32>
    tpu.vector_store %arg4[%c0_22, %c0_23, %c0_24], %99 {strides = array<i32>} : memref<4x8x8xf32, #tpu.memory_space<vmem>>, vector<4x8x8xf32>,
    return
  }
  func.func @transform_0(%arg0: i32) -> (i32, i32) {
    %c0_i32 = arith.constant 0 : i32
    %c0_i32_0 = arith.constant 0 : i32
    %c0_i32_1 = arith.constant 0 : i32
    return %c0_i32, %c0_i32_0 : i32, i32
  }
  func.func @transform_1(%arg0: i32) -> (i32, i32, i32) {
    %c0_i32 = arith.constant 0 : i32
    %c0_i32_0 = arith.constant 0 : i32
    %c0_i32_1 = arith.constant 0 : i32
    return %arg0, %c0_i32, %c0_i32_0 : i32, i32, i32
  }
  func.func @transform_2(%arg0: i32) -> (i32, i32, i32) {
    %c0_i32 = arith.constant 0 : i32
    %c0_i32_0 = arith.constant 0 : i32
    %c0_i32_1 = arith.constant 0 : i32
    return %arg0, %c0_i32, %c0_i32_0 : i32, i32, i32
  }
  func.func @transform_3(%arg0: i32) -> (i32, i32, i32) {
    %c0_i32 = arith.constant 0 : i32
    %c0_i32_0 = arith.constant 0 : i32
    %c0_i32_1 = arith.constant 0 : i32
    return %arg0, %c0_i32, %c0_i32_0 : i32, i32, i32
  }
}

</mosaic_0001>

<bundles_post_ra>
// kernel: tile.19
= control target key start
LH: loop header
LB: loop body
LE: loop exit
PB: predicated region body
PF: predicated region fallthrough
CT: control target
= control target key end

     0   :  { %s46_s8 = smov 96   ;;  %s19_s9 = smov 3  ;;  %vm4_vm0 = vcmask 261120   ;;  %vm10_vm1 = vcmask 1048320   ;;  %vm16_vm2 = vcmask 785920   ;;  %vm23_vm3 = vcmask 523520   ;;  %s77_s0 = inlined_call_operand.vmem [shape: f32[6,32], index: 0, kind: input, shape index: {}]   ;;  %s78_s1 = inlined_call_operand.vmem [shape: f32[1,192], index: 1, kind: output, shape index: {}]  }
   0x1   :  { %v39_v0 = vld [vmem:[%s77_s0 + $0x3] sm:$0x1]   ;;  %v40_v1 = vld [vmem:[%s77_s0 + $0x2] sm:$0x1]   ;;  %v41_v2 = vld [vmem:[%s77_s0 + $0x1] ss:$4 sm:%s19_s9]  }
   0x2   :  { %8 = vrot.lane.b32.xlu0 %v39_v0, %s46_s8  ;;  %s2_s14 = smov 3  ;;  %s47_s15 = smov 32  }
   0x3   :  { %21 = vrot.lane.b32.xlu1 %v41_v2, %s47_s15  ;;  %v3_v3 = vld [vmem:[%s77_s0] ss:$4 sm:%s2_s14]   ;;  %s48_s0 = smov 64  }
   0x4   :  { %5 = vst.msk [vmem:[#allocation0] ss:$8 sm:$0x3] %vm4_vm0, %v3_v3  }
   0x6   :  { %14 = vrot.lane.b32.xlu0 %v40_v1, %s48_s0 }
  0x74   :  { %v9_v4 = vpop.permute.xlu0 %8  }
  0x75   :  { %11 = vst.msk [vmem:[#allocation0] sm:$0x1] %vm10_vm1, %v9_v4   ;;  %v22_v5 = vpop.permute.xlu1 %21  }
  0x78   :  { %v15_v6 = vpop.permute.xlu0 %14  }
  0x79   :  { %17 = vst.msk [vmem:[#allocation0] sm:$0x1] %vm16_vm2, %v15_v6  }
  0x7a   :  { %24 = vst.msk [vmem:[#allocation0] ss:$8 sm:$0x3] %vm23_vm3, %v22_v5  }
  0x81   :  { %v29_v7 = vld [vmem:[#allocation0] sm:$0x1]  ;;  %v34_v8 = vld [vmem:[#allocation0 + $0x8] sm:$0x1] }
  0x82   :  { %32 = vst [vmem:[%s78_s1] sm:$0x1] %v29_v7  ;;  %42 = vst [vmem:[%s78_s1 + $0x1] sm:$0x1] %v34_v8 }

// kernel: tile.17
= control target key start
LH: loop header
LB: loop body
LE: loop exit
PB: predicated region body
PF: predicated region fallthrough
CT: control target
= control target key end

     0   :  { %s22_s0 = inlined_call_operand.vmem [shape: f32[32], index: 0, kind: input, shape index: {}]   ;;  %s23_s1 = inlined_call_operand.vmem [shape: f32[6,32], index: 1, kind: output, shape index: {}]  }
   0x1   :  { %v4_v0 = vld [vmem:[%s22_s0] ss:$0 sm:$0xff] }
   0x2   :  { %5 = vst [vmem:[%s23_s1] sm:$0xff] %v4_v0 }

// kernel: attention_forward.1
= control target key start
LH: loop header
LB: loop body
LE: loop exit
PB: predicated region body
PF: predicated region fallthrough
CT: control target
= control target key end

     0   :  { %9 = vsyncpa [#allocation3], 0  ;;  %s1617_s0 = inlined_call_operand.vmem [shape: f32[3,192], index: 0, kind: input, shape index: {}]   ;;  %s1618_s1 = inlined_call_operand.vmem [shape: f32[8,8,192], index: 1, kind: input, shape index: {}]   ;;  %s1619_s2 = inlined_call_operand.hbm [shape: f32[8,8,32], index: 2, kind: output, shape index: {0}]   ;;  %s1620_s3 = inlined_call_operand.vmem [shape: f32[8,8,8], index: 3, kind: output, shape index: {1}]  }
   0x1   :  { %11 = vsyncpa [#allocation3 + $0x1], 0  ;;  %s1202_s12 = smov 0   ;;  %s1204_s13 = smov 0  }
   0x2   :  { %s1206_s14 = smov 0   ;;  %s1208_s15 = smov 0  }
   0x3 LB: > { %s1223_s16 = sadd.s32 4294967295, %s1169_s15   ;;  %s980_s17 = sadd.s32 4294967294, %s1169_s15   ;;  %s1169_s15 = sphi %s1208_s15, %s1626_s15   ;;  %s1165_s14 = sphi %s1206_s14, %s1625_s14   ;;  %s1161_s13 = sphi %s1204_s13, %s1624_s13   ;;  %s1157_s12 = sphi %s1202_s12, %s1623_s12  }
   0x4   : > { %s1227_s18 = sadd.s32 1, %s1169_s15   ;;  %s71_s19 = sadd.s32 1, %s1165_s14 }
   0x5   : > { %s68_s20 = ssub.s32 %s1169_s15, %s1227_s18  ;;  %p81_p0 = scmp.ne.s32.totalorder %s1165_s14, %s1161_s13 }
   0x6   : > { %p69_p1 = scmp.eq.s32.totalorder %s68_s20, 0  ;;  %p82_p2 = scmp.eq.s32.totalorder %s1223_s16, 1 }
   0x7   : > { %p87_p3 = scmp.ne.s32.totalorder %s1161_s13, %s1157_s12  ;;  %p88_p4 = scmp.eq.s32.totalorder %s980_s17, 1 }
   0x8   : > { %s1238_s21 = scalar_select %p69_p1, %s1165_s14, %s71_s19  }
   0x9   : > { %p1240_p5 = por %p82_p2, %p81_p0  ;;  %p1244_p6 = por %p88_p4, %p87_p3 }
   0xa   : > { %p983_p7 = scmp.ge.s32.totalorder %s1169_s15, 1  ;;  %p145_p8 = scmp.lt.s32.totalorder %s1169_s15, 3 }
   0xc   : > { %p146_p9 = pnand %p983_p7, %p145_p8 }
   0xd   : > { %s985_s24 = sshll.u32 (!%p146_p9), %s1223_s16, 2  ;;  %s1171_s4 = smov (!%p146_p9), 64  }
   0xe   : > { %149 = sbr.rel (%p146_p9) target bundleno = 1945 (0x799), region = 28  ;;  %p176_p10 = scmp.lt.s32.totalorder (!%p146_p9), %s985_s24, 7 }
   0xf   : > { %s1172_s5 = smov (!%p146_p9), 32   ;;  %s1173_s6 = smov (!%p146_p9), 96  }
  0x10   : > { %s1178_s11 = smov (!%p146_p9), 4   ;;  %s165_s17 = sand.u32 (!%p146_p9), 1, %s1161_s13  }
  0x11   : > { %s984_s20 = sshll.u32 (!%p146_p9), %s165_s17, 5  ;;  %s998_s28 = sshll.u32 (!%p146_p9), %s1223_s16, 9 }
  0x12   : > { %s1577_s16 = scalar_lea.sflag (!%p146_p9), [#allocation3], %s165_s17  ;;  %s1179_s7 = smov (!%p146_p9), [#allocation2]  }
  0x13   : > { %v201_v0 = vlaneseq  ;;  %s1628_s24 = smov (!%p176_p10, %s985_s24), 7  ;;  %v197_v2 = vld [vmem:[%s1617_s0] ss:$4 sm:$0x3]  ;;  %vm219_vm0 = vcmask 261120   ;;  %vm348_vm1 = vcmask 7168  }
  0x14   : > { %s997_s27 = sshll.u32 %s1628_s24, 4  ;;  %vm353_vm2 = vcmask 15360   ;;  %vm358_vm3 = vcmask 23552   ;;  %vm363_vm4 = vcmask 31744   ;;  %s989_s19 = sshll.u32 %s1628_s24, 3  ;;  %vm860_vm5 = vcmask 56320  }
  0x15   : > { %v202_v1 = vshrl.u32 %v201_v0, 7  ;;  %s180_s30 = scalar_lea.vmem %s1618_s1, %s997_s27  ;;  %s1537_s27 = scalar_lea.vmem %s1620_s3, %s989_s19  ;;  %vm865_vm6 = vcmask 64512  }
  0x16   : > { %v1260_v5 = vld [vmem:[%s180_s30] sm:$0xff]  ;;  %v1262_v6 = vld [vmem:[%s180_s30 + $0x10] sm:$0xff]  ;;  %v1292_v15 = vld [vmem:[%s180_s30 + $0x8] sm:$0xff]  ;;  %s167_s24 = scalar_lea.vmem [#allocation2], %s984_s20  ;;  %s1113_s8 = sshll.u32 %s1179_s7, 4  ;;  %s1114_s8 = int_to_ptr.vmem [resolvable:$false] %s1113_s8 }
  0x17   : > { %v203_v3 = vsub.s32 0, %v202_v1  ;;  %v1264_v7 = vld [vmem:[%s180_s30 + $0x20] sm:$0xff]  ;;  %v1279_v11 = vld [vmem:[%s180_s30 + $0x30] sm:$0xff]  ;;  %v207_v13 = vsub.s32 1, %v202_v1  ;;  %v1294_v16 = vld [vmem:[%s180_s30 + $0x18] sm:$0xff]  ;;  %s889_s29 = sshll.u32 %s167_s24, 4  ;;  %s1568_s29 = int_to_ptr.vmem [resolvable:$true] %s889_s29 }
  0x18   : > { %v1302_v19 = vld [vmem:[%s180_s30 + $0x28] sm:$0xff]  ;;  %v1304_v20 = vld [vmem:[%s180_s30 + $0x38] sm:$0xff]  ;;  %s1115_s9 = scalar_lea.vmem %s1114_s8, 1024  ;;  %p1116_p0 = scmp.lt.s32.totalorder %s1568_s29, %s1114_s8 }
  0x19   : > { %v204_v4 = vrot.slane %v197_v2, %v203_v3  ;;  %v208_v14 = vrot.slane %v197_v2, %v207_v13 }
  0x1b   : > { %v1267_v8 = vmul.f32 %v204_v4, %v1260_v5  ;;  %v1270_v9 = vmul.f32 %v204_v4, %v1262_v6  ;;  %v1277_v10 = vmul.f32 %v204_v4, %v1264_v7  ;;  %v1286_v12 = vmul.f32 %v204_v4, %v1279_v11 }
  0x1c   : > { %v212_v17 = vmul.f32 %v208_v14, %v1292_v15  ;;  %v214_v18 = vmul.f32 %v208_v14, %v1294_v16  ;;  %v216_v21 = vmul.f32 %v208_v14, %v1302_v19  ;;  %v218_v22 = vmul.f32 %v208_v14, %v1304_v20 }
  0x1d   : > { %260 = vrot.lane.b32.xlu0 %v1267_v8, %s1171_s4  ;;  %262 = vrot.lane.b32.xlu1 %v1270_v9, %s1171_s4 }
  0x1e   : > { %v311_v23 = vsel %vm219_vm0, %v214_v18, 0.0  ;;  %v317_v24 = vsel %vm219_vm0, %v218_v22, 0.0  ;;  %v308_v25 = vsel %vm219_vm0, %v212_v17, 0.0  ;;  %v314_v26 = vsel %vm219_vm0, %v216_v21, 0.0 }
  0x21   : > { %284 = vrot.lane.b32.xlu0 %v1267_v8, %s1172_s5  ;;  %264 = vrot.lane.b32.xlu1 %v1277_v10, %s1171_s4 }
  0x25   : > { %266 = vrot.lane.b32.xlu0 %v1286_v12, %s1171_s4  ;;  %286 = vrot.lane.b32.xlu1 %v1270_v9, %s1172_s5 }
  0x29   : > { %288 = vrot.lane.b32.xlu0 %v1277_v10, %s1172_s5  ;;  %290 = vrot.lane.b32.xlu1 %v1286_v12, %s1172_s5 }
  0x2d   : > { %324 = vrot.lane.b32.xlu0 %v212_v17, %s1173_s6  ;;  %326 = vrot.lane.b32.xlu1 %v214_v18, %s1173_s6 }
  0x31   : > { %328 = vrot.lane.b32.xlu0 %v216_v21, %s1173_s6  ;;  %330 = vrot.lane.b32.xlu1 %v218_v22, %s1173_s6 }
  0x50   : > { %312 = vadd.xlane.f32.xlu0 %v311_v23 }
  0x54   : > { %318 = vadd.xlane.f32.xlu0 %v317_v24 }
  0x55   : > { %309 = vadd.xlane.f32.xlu1 %v308_v25 }
  0x59   : > { %315 = vadd.xlane.f32.xlu1 %v314_v26 }
  0x8f   : > { %v261_v27 = vpop.permute.xlu0 %260  ;;  %v263_v28 = vpop.permute.xlu1 %262 }
  0x90   : > { %v272_v29 = vsel %vm219_vm0, %v261_v27, 0.0  ;;  %v275_v30 = vsel %vm219_vm0, %v263_v28, 0.0 }
  0x91   : > { %273 = vadd.xlane.f32.xlu0 %v272_v29 }
  0x93   : > { %v285_v31 = vpop.permute.xlu0 %284  ;;  %v265_v32 = vpop.permute.xlu1 %264 }
  0x94   : > { %v296_v33 = vsel %vm219_vm0, %v285_v31, 0.0  ;;  %v278_v34 = vsel %vm219_vm0, %v265_v32, 0.0 }
  0x95   : > { %276 = vadd.xlane.f32.xlu0 %v275_v30  ;;  %297 = vadd.xlane.f32.xlu1 %v296_v33 }
  0x97   : > { %v267_v35 = vpop.permute.xlu0 %266  ;;  %v287_v36 = vpop.permute.xlu1 %286 }
  0x98   : > { %v281_v37 = vsel %vm219_vm0, %v267_v35, 0.0  ;;  %v299_v38 = vsel %vm219_vm0, %v287_v36, 0.0 }
  0x99   : > { %279 = vadd.xlane.f32.xlu0 %v278_v34  ;;  %282 = vadd.xlane.f32.xlu1 %v281_v37 }
  0x9b   : > { %v289_v39 = vpop.permute.xlu0 %288  ;;  %v291_v40 = vpop.permute.xlu1 %290 }
  0x9c   : > { %v302_v41 = vsel %vm219_vm0, %v289_v39, 0.0  ;;  %v305_v42 = vsel %vm219_vm0, %v291_v40, 0.0 }
  0x9d   : > { %300 = vadd.xlane.f32.xlu0 %v299_v38  ;;  %303 = vadd.xlane.f32.xlu1 %v302_v41 }
  0x9f   : > { %v325_v43 = vpop.permute.xlu0 %324  ;;  %v327_v44 = vpop.permute.xlu1 %326 }
  0xa0   : > { %v336_v45 = vsel %vm219_vm0, %v325_v43, 0.0  ;;  %v339_v46 = vsel %vm219_vm0, %v327_v44, 0.0 }
  0xa1   : > { %306 = vadd.xlane.f32.xlu0 %v305_v42  ;;  %337 = vadd.xlane.f32.xlu1 %v336_v45 }
  0xa3   : > { %v329_v47 = vpop.permute.xlu0 %328  ;;  %v331_v48 = vpop.permute.xlu1 %330 }
  0xa4   : > { %v342_v49 = vsel %vm219_vm0, %v329_v47, 0.0  ;;  %v345_v50 = vsel %vm219_vm0, %v331_v48, 0.0 }
  0xa5   : > { %340 = vadd.xlane.f32.xlu0 %v339_v46  ;;  %343 = vadd.xlane.f32.xlu1 %v342_v49 }
  0xa9   : > { %346 = vadd.xlane.f32.xlu0 %v345_v50 }
  0xd9   : > { %v313_v51 = vpop.xlane.xlu0 %312 }
  0xdd   : > { %v319_v53 = vpop.xlane.xlu0 %318 }
  0xde   : > { %v310_v52 = vpop.xlane.xlu1 %309 }
  0xe2   : > { %v316_v54 = vpop.xlane.xlu1 %315 }
 0x11a   : > { %v274_v55 = vpop.xlane.xlu0 %273 }
 0x11e   : > { %v298_v56 = vpop.xlane.xlu1 %297  ;;  %v277_v57 = vpop.xlane.xlu0 %276 }
 0x11f   : > { %v349_v62 = vsel %vm348_vm1, %v274_v55, %v298_v56 }
 0x120   : > { %v354_v1 = vsel %vm353_vm2, %v349_v62, %v310_v52 }
 0x122   : > { %v283_v58 = vpop.xlane.xlu1 %282  ;;  %v280_v59 = vpop.xlane.xlu0 %279 }
 0x126   : > { %v304_v60 = vpop.xlane.xlu1 %303  ;;  %v301_v61 = vpop.xlane.xlu0 %300 }
 0x127   : > { %v351_v2 = vsel %vm348_vm1, %v280_v59, %v304_v60  ;;  %v350_v3 = vsel %vm348_vm1, %v277_v57, %v301_v61 }
 0x128   : > { %v356_v18 = vsel %vm353_vm2, %v351_v2, %v316_v54  ;;  %v355_v21 = vsel %vm353_vm2, %v350_v3, %v313_v51  ;;  %v1174_v51 = vmov 1   ;;  %v1177_v2 = vmov 0  }
 0x129   : > { %1048 = vset.pattern.permute.xlu1 %v1174_v51  ;;  %1049 = vset.pattern.permute.xlu0 %v1174_v51 }
 0x12a   : > { %v338_v63 = vpop.xlane.xlu1 %337  ;;  %v307_v0 = vpop.xlane.xlu0 %306 }
 0x12b   : > { %v359_v4 = vsel %vm358_vm3, %v354_v1, %v338_v63  ;;  %v352_v22 = vsel %vm348_vm1, %v283_v58, %v307_v0  ;;  %v1175_v0 = vmov 3   ;;  %v1176_v1 = vmov 2  }
 0x12c   : > { %v364_v13 = vsel %vm363_vm4, %v359_v4, -inf  ;;  %v357_v28 = vsel %vm353_vm2, %v352_v22, %v319_v53 }
 0x12d   : > { %365 = vmax.xlane.f32.xlu1 %v364_v13 }
 0x12e   : > { %v344_v14 = vpop.xlane.xlu1 %343  ;;  %v341_v17 = vpop.xlane.xlu0 %340 }
 0x12f   : > { %v361_v23 = vsel %vm358_vm3, %v356_v18, %v344_v14  ;;  %v360_v24 = vsel %vm358_vm3, %v355_v21, %v341_v17 }
 0x130   : > { %v370_v25 = vsel %vm363_vm4, %v361_v23, -inf  ;;  %v367_v26 = vsel %vm363_vm4, %v360_v24, -inf }
 0x131   : > { %371 = vmax.xlane.f32.xlu1 %v370_v25  ;;  %368 = vmax.xlane.f32.xlu0 %v367_v26 }
 0x132   : > { %v347_v27 = vpop.xlane.xlu0 %346 }
 0x133   : > { %v362_v29 = vsel %vm358_vm3, %v357_v28, %v347_v27 }
 0x134   : > { %v373_v30 = vsel %vm363_vm4, %v362_v29, -inf }
 0x135   : > { %374 = vmax.xlane.f32.xlu0 %v373_v30 }
 0x1b6   : > { %v366_v31 = vpop.xlane.xlu1 %365 }
 0x1b7   : > { %v376_v32 = vsub.f32 %v359_v4, %v366_v31 }
 0x1b9   : > { %v380_v33 = vmul.f32 1.442695, %v376_v32 }
 0x1ba   : > { %v372_v34 = vpop.xlane.xlu1 %371  ;;  %v369_v35 = vpop.xlane.xlu0 %368 }
 0x1bb   : > { %1061 = vpow2.f32 %v380_v33  ;;  %v378_v36 = vsub.f32 %v361_v23, %v372_v34  ;;  %v377_v37 = vsub.f32 %v360_v24, %v369_v35 }
 0x1bd   : > { %v384_v38 = vmul.f32 1.442695, %v378_v36  ;;  %v382_v39 = vmul.f32 1.442695, %v377_v37 }
 0x1be   : > { %v375_v40 = vpop.xlane.xlu0 %374 }
 0x1bf   : > { %1063 = vpow2.f32 %v384_v38  ;;  %v379_v41 = vsub.f32 %v362_v29, %v375_v40  ;;  %v990_v38 = vld [vmem:[%s1617_s0 + $0x1] ss:$0 sm:$0xff] }
 0x1c0   : > { %1065 = vpow2.f32 %v382_v39 }
 0x1c1   : > { %v386_v42 = vmul.f32 1.442695, %v379_v41 }
 0x1c3   : > { %1067 = vpow2.f32 %v386_v42 }
 0x1c8   : > { %v1062_v43 = vpop.eup %1061 }
 0x1c9   : > { %v388_v44 = vsel %vm363_vm4, %v1062_v43, 0.0 }
 0x1ca   : > { %389 = vadd.xlane.f32.xlu1 %v388_v44 }
 0x1cc   : > { %v1064_v45 = vpop.eup %1063 }
 0x1cd   : > { %v1066_v46 = vpop.eup %1065  ;;  %v394_v47 = vsel %vm363_vm4, %v1064_v45, 0.0 }
 0x1ce   : > { %395 = vadd.xlane.f32.xlu1 %v394_v47  ;;  %v391_v48 = vsel %vm363_vm4, %v1066_v46, 0.0 }
 0x1cf   : > { %392 = vadd.xlane.f32.xlu0 %v391_v48 }
 0x1d0   : > { %v1068_v49 = vpop.eup %1067 }
 0x1d1   : > { %v397_v50 = vsel %vm363_vm4, %v1068_v49, 0.0 }
 0x1d3   : > { %398 = vadd.xlane.f32.xlu0 %v397_v50 }
 0x253   : > { %v390_v52 = vpop.xlane.xlu1 %389 }
 0x254   : > { %1069 = vrcp.f32 %v390_v52 }
 0x257   : > { %v396_v53 = vpop.xlane.xlu1 %395 }
 0x258   : > { %1071 = vrcp.f32 %v396_v53  ;;  %v393_v54 = vpop.xlane.xlu0 %392 }
 0x259   : > { %1073 = vrcp.f32 %v393_v54 }
 0x25c   : > { %v399_v55 = vpop.xlane.xlu0 %398 }
 0x25d   : > { %1075 = vrcp.f32 %v399_v55 }
 0x261   : > { %v1070_v56 = vpop.eup %1069 }
 0x262   : > { %v1348_v57 = vmul.f32 %v1070_v56, %v1062_v43 }
 0x264   : > { %433 = vperm.xlu1 %1048, %v1348_v57  }
 0x265   : > { %v1072_v58 = vpop.eup %1071 }
 0x266   : > { %v1074_v59 = vpop.eup %1073  ;;  %v1351_v60 = vmul.f32 %v1072_v58, %v1064_v45 }
 0x267   : > { %v1353_v61 = vmul.f32 %v1074_v59, %v1066_v46 }
 0x268   : > { %441 = vperm.xlu1 %1048, %v1351_v60  }
 0x269   : > { %437 = vperm.xlu0 %1049, %v1353_v61  }
 0x26a   : > { %v1076_v62 = vpop.eup %1075 }
 0x26b   : > { %v1357_v63 = vmul.f32 %v1076_v62, %v1068_v49 }
 0x26d   : > { %1052 = vset.pattern.permute.xlu0 %v1175_v0  ;;  %445 = vperm.xlu1 %1048, %v1357_v63  }
 0x26e   : > { %521 = vperm.xlu0 %1052, %v1351_v60  }
 0x271   : > { %1050 = vset.pattern.permute.xlu1 %v1176_v1 }
 0x272   : > { %1054 = vset.pattern.permute.xlu0 %v1177_v2  ;;  %473 = vperm.xlu1 %1050, %v1348_v57  }
 0x273   : > { %415 = vperm.xlu0 %1054, %v1353_v61  }
 0x276   : > { %477 = vperm.xlu1 %1050, %v1353_v61  }
 0x277   : > { %1055 = vset.pattern.permute.xlu0 %v1174_v51 }
 0x27a   : > { %481 = vperm.xlu1 %1050, %v1351_v60  }
 0x27e   : > { %485 = vperm.xlu1 %1050, %v1357_v63  }
 0x282   : > { %1051 = vset.pattern.permute.xlu1 %v1175_v0 }
 0x283   : > { %513 = vperm.xlu1 %1051, %v1348_v57  }
 0x287   : > { %517 = vperm.xlu1 %1051, %v1353_v61  }
 0x28b   : > { %525 = vperm.xlu1 %1051, %v1357_v63  }
 0x28f   : > { %1053 = vset.pattern.permute.xlu1 %v1177_v2 }
 0x290   : > { %410 = vperm.xlu1 %1053, %v1348_v57  }
 0x294   : > { %420 = vperm.xlu1 %1053, %v1351_v60  }
 0x298   : > { %425 = vperm.xlu1 %1053, %v1357_v63  }
 0x29c   : > { %1056 = vset.pattern.permute.xlu1 %v1174_v51 }
 0x2df   : > { %v434_v3 = vpop.permute.xlu1 %433 }
 0x2e0   : > { %v448_v4 = vmul.f32 %v434_v3, %v1260_v5 }
 0x2e2   : > { %456 = vrot.lane.b32.xlu0 %v448_v4, %s1173_s6 }
 0x2e3   : > { %v442_v13 = vpop.permute.xlu1 %441 }
 0x2e4   : > { %v450_v14 = vmul.f32 %v442_v13, %v1264_v7  ;;  %v438_v17 = vpop.permute.xlu0 %437 }
 0x2e5   : > { %v449_v18 = vmul.f32 %v438_v17, %v1262_v6 }
 0x2e6   : > { %460 = vrot.lane.b32.xlu0 %v450_v14, %s1173_s6 }
 0x2e7   : > { %458 = vrot.lane.b32.xlu1 %v449_v18, %s1173_s6 }
 0x2e8   : > { %v446_v21 = vpop.permute.xlu1 %445 }
 0x2e9   : > { %v451_v22 = vmul.f32 %v446_v21, %v1279_v11  ;;  %v522_v33 = vpop.permute.xlu0 %521 }
 0x2ea   : > { %v530_v35 = vmul.f32 %v522_v33, %v1302_v19  ;;  %v226_v33 = vsel %vm219_vm0, %v1277_v10, 0.0 }
 0x2eb   : > { %462 = vrot.lane.b32.xlu1 %v451_v22, %s1173_s6 }
 0x2ed   : > { %v474_v23 = vpop.permute.xlu1 %473 }
 0x2ee   : > { %v488_v24 = vmul.f32 %v474_v23, %v1292_v15 }
 0x2f0   : > { %496 = vrot.lane.b32.xlu0 %v488_v24, %s1171_s4 }
 0x2f1   : > { %v478_v25 = vpop.permute.xlu1 %477 }
 0x2f2   : > { %v489_v26 = vmul.f32 %v478_v25, %v1294_v16 }
 0x2f4   : > { %498 = vrot.lane.b32.xlu1 %v489_v26, %s1171_s4 }
 0x2f5   : > { %v482_v27 = vpop.permute.xlu1 %481 }
 0x2f6   : > { %v490_v28 = vmul.f32 %v482_v27, %v1302_v19  ;;  %v416_v19 = vpop.permute.xlu0 %415 }
 0x2f7   : > { %v429_v49 = vmul.f32 %v416_v19, %v1262_v6 }
 0x2f8   : > { %500 = vrot.lane.b32.xlu0 %v490_v28, %s1171_s4 }
 0x2f9   : > { %v486_v29 = vpop.permute.xlu1 %485 }
 0x2fa   : > { %v491_v30 = vmul.f32 %v486_v29, %v1304_v20  ;;  %v223_v29 = vsel %vm219_vm0, %v1270_v9, 0.0 }
 0x2fc   : > { %502 = vrot.lane.b32.xlu1 %v491_v30, %s1171_s4  ;;  %v220_v30 = vsel %vm219_vm0, %v1267_v8, 0.0 }
 0x2fe   : > { %v514_v31 = vpop.permute.xlu1 %513 }
 0x2ff   : > { %v528_v32 = vmul.f32 %v514_v31, %v1292_v15  ;;  %v229_v31 = vsel %vm219_vm0, %v1286_v12, 0.0 }
 0x301   : > { %536 = vrot.lane.b32.xlu0 %v528_v32, %s1172_s5 }
 0x302   : > { %v518_v34 = vpop.permute.xlu1 %517 }
 0x303   : > { %v529_v36 = vmul.f32 %v518_v34, %v1294_v16 }
 0x305   : > { %538 = vrot.lane.b32.xlu1 %v529_v36, %s1172_s5  ;;  %540 = vrot.lane.b32.xlu0 %v530_v35, %s1172_s5 }
 0x306   : > { %v526_v37 = vpop.permute.xlu1 %525 }
 0x307   : > { %v531_v39 = vmul.f32 %v526_v37, %v1304_v20 }
 0x309   : > { %542 = vrot.lane.b32.xlu1 %v531_v39, %s1172_s5  ;;  %557 = vrot.lane.b32.xlu0 %v990_v38, %s1171_s4  ;;  %s1566_s5 = scalar_lea.hbm %s1619_s2, %s998_s28 }
 0x30b   : > { %v411_v15 = vpop.permute.xlu1 %410 }
 0x30c   : > { %v428_v50 = vmul.f32 %v411_v15, %v1260_v5 }
 0x30d   : > { %236 = vrot.lane.b32.xlu1 %v1267_v8, %s1173_s6  ;;  %238 = vrot.lane.b32.xlu0 %v1270_v9, %s1173_s6 }
 0x30f   : > { %v421_v16 = vpop.permute.xlu1 %420 }
 0x310   : > { %v430_v56 = vmul.f32 %v421_v16, %v1264_v7 }
 0x311   : > { %240 = vrot.lane.b32.xlu1 %v1277_v10, %s1173_s6  ;;  %242 = vrot.lane.b32.xlu0 %v1286_v12, %s1173_s6 }
 0x313   : > { %v426_v20 = vpop.permute.xlu1 %425 }
 0x314   : > { %v431_v51 = vmul.f32 %v426_v20, %v1279_v11 }
 0x354   : > { %v457_v40 = vpop.permute.xlu0 %456 }
 0x355   : > { %v468_v52 = vadd.f32 %v457_v40, %v428_v50 }
 0x358   : > { %v461_v42 = vpop.permute.xlu0 %460 }
 0x359   : > { %v459_v41 = vpop.permute.xlu1 %458  ;;  %v470_v0 = vadd.f32 %v461_v42, %v430_v56 }
 0x35a   : > { %v469_v53 = vadd.f32 %v459_v41, %v429_v49 }
 0x35d   : > { %v463_v43 = vpop.permute.xlu1 %462 }
 0x35e   : > { %v471_v58 = vadd.f32 %v463_v43, %v431_v51 }
 0x362   : > { %v497_v44 = vpop.permute.xlu0 %496 }
 0x363   : > { %v508_v59 = vadd.f32 %v497_v44, %v468_v52 }
 0x366   : > { %v499_v45 = vpop.permute.xlu1 %498 }
 0x367   : > { %v509_v62 = vadd.f32 %v499_v45, %v469_v53 }
 0x36a   : > { %v501_v46 = vpop.permute.xlu0 %500 }
 0x36b   : > { %v510_v18 = vadd.f32 %v501_v46, %v470_v0 }
 0x36e   : > { %v503_v47 = vpop.permute.xlu1 %502 }
 0x36f   : > { %v511_v3 = vadd.f32 %v503_v47, %v471_v58 }
 0x373   : > { %v537_v48 = vpop.permute.xlu0 %536 }
 0x374   : > { %v1415_v4 = vadd.f32 %v537_v48, %v508_v59 }
 0x377   : > { %v539_v54 = vpop.permute.xlu1 %538  ;;  %v541_v55 = vpop.permute.xlu0 %540 }
 0x378   : > { %v1417_v13 = vadd.f32 %v539_v54, %v509_v62  ;;  %v1423_v24 = vadd.f32 %v541_v55, %v510_v18 }
 0x37b   : > { %v543_v14 = vpop.permute.xlu1 %542  ;;  %v558_v17 = vpop.permute.xlu0 %557 }
 0x37c   : > { %v1419_v21 = vadd.f32 %v543_v14, %v511_v3  ;;  %v561_v22 = vmul.f32 %v558_v17, %v1417_v13  ;;  %v560_v23 = vmul.f32 %v558_v17, %v1415_v4  ;;  %v562_v26 = vmul.f32 %v558_v17, %v1423_v24 }
 0x37e   : > { %570 = vrot.lane.b32.xlu0 %v561_v22, %s1171_s4  ;;  %568 = vrot.lane.b32.xlu1 %v560_v23, %s1171_s4  ;;  %v563_v25 = vmul.f32 %v558_v17, %v1419_v21 }
 0x37f   : > { %v237_v27 = vpop.permute.xlu1 %236  ;;  %v239_v32 = vpop.permute.xlu0 %238 }
 0x380   : > { %v248_v28 = vsel %vm219_vm0, %v237_v27, 0.0  ;;  %v251_v36 = vsel %vm219_vm0, %v239_v32, 0.0 }
 0x382   : > { %574 = vrot.lane.b32.xlu0 %v563_v25, %s1171_s4  ;;  %572 = vrot.lane.b32.xlu1 %v562_v26, %s1171_s4 }
 0x383   : > { %v241_v34 = vpop.permute.xlu1 %240  ;;  %v243_v9 = vpop.permute.xlu0 %242 }
 0x384   : > { %v254_v35 = vsel %vm219_vm0, %v241_v34, 0.0  ;;  %v257_v8 = vsel %vm219_vm0, %v243_v9, 0.0 }
 0x3a1   : > { %249 = vadd.xlane.f32.xlu0 %v248_v28 }
 0x3a5   : > { %224 = vadd.xlane.f32.xlu0 %v223_v29 }
 0x3a6   : > { %221 = vadd.xlane.f32.xlu1 %v220_v30 }
 0x3a9   : > { %230 = vadd.xlane.f32.xlu0 %v229_v31 }
 0x3aa   : > { %227 = vadd.xlane.f32.xlu1 %v226_v33 }
 0x3ad   : > { %255 = vadd.xlane.f32.xlu0 %v254_v35 }
 0x3ae   : > { %252 = vadd.xlane.f32.xlu1 %v251_v36 }
 0x3b2   : > { %258 = vadd.xlane.f32.xlu1 %v257_v8 }
 0x3f0   : > { %v569_v37 = vpop.permute.xlu1 %568  ;;  %v571_v38 = vpop.permute.xlu0 %570 }
 0x3f1   : > { %v580_v12 = vsel %vm219_vm0, %v569_v37, 0.0  ;;  %v583_v39 = vsel %vm219_vm0, %v571_v38, 0.0 }
 0x3f2   : > { %581 = vadd.xlane.f32.xlu0 %v580_v12  ;;  %584 = vadd.xlane.f32.xlu1 %v583_v39 }
 0x3f4   : > { %v573_v10 = vpop.permute.xlu1 %572  ;;  %v575_v15 = vpop.permute.xlu0 %574 }
 0x3f5   : > { %v586_v16 = vsel %vm219_vm0, %v573_v10, 0.0  ;;  %v589_v19 = vsel %vm219_vm0, %v575_v15, 0.0 }
 0x3f6   : > { %587 = vadd.xlane.f32.xlu0 %v586_v16  ;;  %590 = vadd.xlane.f32.xlu1 %v589_v19 }
 0x42a   : > { %v250_v20 = vpop.xlane.xlu0 %249 }
 0x42e   : > { %v225_v41 = vpop.xlane.xlu0 %224 }
 0x42f   : > { %v222_v40 = vpop.xlane.xlu1 %221 }
 0x430   : > { %v592_v47 = vsel %vm348_vm1, %v222_v40, %v250_v20 }
 0x432   : > { %v231_v43 = vpop.xlane.xlu0 %230 }
 0x433   : > { %v228_v42 = vpop.xlane.xlu1 %227 }
 0x436   : > { %v256_v45 = vpop.xlane.xlu0 %255 }
 0x437   : > { %v253_v44 = vpop.xlane.xlu1 %252  ;;  %v594_v55 = vsel %vm348_vm1, %v228_v42, %v256_v45 }
 0x438   : > { %v593_v48 = vsel %vm348_vm1, %v225_v41, %v253_v44 }
 0x43b   : > { %v259_v46 = vpop.xlane.xlu1 %258 }
 0x43c   : > { %v595_v56 = vsel %vm348_vm1, %v231_v43, %v259_v46 }
 0x47b   : > { %v582_v49 = vpop.xlane.xlu0 %581  ;;  %v585_v50 = vpop.xlane.xlu1 %584 }
 0x47c   : > { %v596_v51 = vsel %vm353_vm2, %v592_v47, %v582_v49  ;;  %v597_v52 = vsel %vm353_vm2, %v593_v48, %v585_v50 }
 0x47d   : > { %v600_v53 = vsel %vm358_vm3, %v596_v51, -inf  ;;  %v603_v54 = vsel %vm358_vm3, %v597_v52, -inf }
 0x47e   : > { %601 = vmax.xlane.f32.xlu0 %v600_v53  ;;  %604 = vmax.xlane.f32.xlu1 %v603_v54 }
 0x47f   : > { %v588_v58 = vpop.xlane.xlu0 %587  ;;  %v591_v59 = vpop.xlane.xlu1 %590 }
 0x480   : > { %v598_v62 = vsel %vm353_vm2, %v594_v55, %v588_v58  ;;  %v599_v0 = vsel %vm353_vm2, %v595_v56, %v591_v59 }
 0x481   : > { %v606_v3 = vsel %vm358_vm3, %v598_v62, -inf  ;;  %v609_v14 = vsel %vm358_vm3, %v599_v0, -inf }
 0x482   : > { %607 = vmax.xlane.f32.xlu0 %v606_v3  ;;  %610 = vmax.xlane.f32.xlu1 %v609_v14 }
 0x507   : > { %v602_v17 = vpop.xlane.xlu0 %601  ;;  %v605_v18 = vpop.xlane.xlu1 %604 }
 0x508   : > { %v612_v22 = vsub.f32 %v596_v51, %v602_v17  ;;  %v613_v23 = vsub.f32 %v597_v52, %v605_v18 }
 0x50a   : > { %v616_v25 = vmul.f32 1.442695, %v612_v22  ;;  %v618_v26 = vmul.f32 1.442695, %v613_v23 }
 0x50b   : > { %v608_v27 = vpop.xlane.xlu0 %607  ;;  %v611_v28 = vpop.xlane.xlu1 %610 }
 0x50c   : > { %1077 = vpow2.f32 %v616_v25  ;;  %v614_v29 = vsub.f32 %v598_v62, %v608_v27  ;;  %v615_v30 = vsub.f32 %v599_v0, %v611_v28 }
 0x50d   : > { %1079 = vpow2.f32 %v618_v26 }
 0x50e   : > { %v620_v31 = vmul.f32 1.442695, %v614_v29  ;;  %v622_v32 = vmul.f32 1.442695, %v615_v30 }
 0x510   : > { %1081 = vpow2.f32 %v620_v31 }
 0x511   : > { %1083 = vpow2.f32 %v622_v32 }
 0x519   : > { %v1078_v33 = vpop.eup %1077 }
 0x51a   : > { %v1080_v34 = vpop.eup %1079  ;;  %v624_v35 = vsel %vm358_vm3, %v1078_v33, 0.0 }
 0x51b   : > { %625 = vadd.xlane.f32.xlu0 %v624_v35  ;;  %v627_v36 = vsel %vm358_vm3, %v1080_v34, 0.0 }
 0x51c   : > { %628 = vadd.xlane.f32.xlu1 %v627_v36 }
 0x51d   : > { %v1082_v9 = vpop.eup %1081 }
 0x51e   : > { %v1084_v8 = vpop.eup %1083  ;;  %v630_v37 = vsel %vm358_vm3, %v1082_v9, 0.0 }
 0x51f   : > { %631 = vadd.xlane.f32.xlu0 %v630_v37  ;;  %v633_v38 = vsel %vm358_vm3, %v1084_v8, 0.0 }
 0x520   : > { %634 = vadd.xlane.f32.xlu1 %v633_v38 }
 0x5a4   : > { %v626_v12 = vpop.xlane.xlu0 %625 }
 0x5a5   : > { %1085 = vrcp.f32 %v626_v12  ;;  %v629_v39 = vpop.xlane.xlu1 %628 }
 0x5a6   : > { %1087 = vrcp.f32 %v629_v39 }
 0x5a8   : > { %v632_v10 = vpop.xlane.xlu0 %631 }
 0x5a9   : > { %1089 = vrcp.f32 %v632_v10  ;;  %v635_v15 = vpop.xlane.xlu1 %634 }
 0x5aa   : > { %1091 = vrcp.f32 %v635_v15 }
 0x5b2   : > { %v1086_v16 = vpop.eup %1085 }
 0x5b3   : > { %v1088_v19 = vpop.eup %1087  ;;  %v1463_v20 = vmul.f32 %v1086_v16, %v1078_v33 }
 0x5b4   : > { %v1465_v40 = vmul.f32 %v1088_v19, %v1080_v34 }
 0x5b5   : > { %669 = vperm.xlu0 %1055, %v1463_v20  }
 0x5b6   : > { %v1090_v41 = vpop.eup %1089  ;;  %673 = vperm.xlu1 %1056, %v1465_v40  }
 0x5b7   : > { %v1469_v42 = vmul.f32 %v1090_v41, %v1082_v9  ;;  %v1092_v43 = vpop.eup %1091 }
 0x5b8   : > { %v1474_v44 = vmul.f32 %v1092_v43, %v1084_v8 }
 0x5b9   : > { %1058 = vset.pattern.permute.xlu0 %v1177_v2 }
 0x5ba   : > { %677 = vperm.xlu1 %1056, %v1469_v42   ;;  %646 = vperm.xlu0 %1058, %v1463_v20  }
 0x5be   : > { %681 = vperm.xlu1 %1056, %v1474_v44   ;;  %661 = vperm.xlu0 %1058, %v1474_v44  }
 0x5c2   : > { %1057 = vset.pattern.permute.xlu1 %v1176_v1  ;;  %1060 = vset.pattern.permute.xlu0 %v1176_v1 }
 0x5c3   : > { %709 = vperm.xlu1 %1057, %v1463_v20  }
 0x5c7   : > { %713 = vperm.xlu1 %1057, %v1465_v40  }
 0x5cb   : > { %717 = vperm.xlu1 %1057, %v1469_v42  }
 0x5cf   : > { %721 = vperm.xlu1 %1057, %v1474_v44  }
 0x5d3   : > { %1059 = vset.pattern.permute.xlu1 %v1177_v2 }
 0x5d4   : > { %651 = vperm.xlu1 %1059, %v1465_v40  }
 0x5d8   : > { %656 = vperm.xlu1 %1059, %v1469_v42  }
 0x630   : > { %v670_v45 = vpop.permute.xlu0 %669 }
 0x631   : > { %v684_v46 = vmul.f32 %v670_v45, %v1260_v5  ;;  %v674_v47 = vpop.permute.xlu1 %673 }
 0x632   : > { %v685_v1 = vmul.f32 %v674_v47, %v1262_v6 }
 0x633   : > { %692 = vrot.lane.b32.xlu1 %v684_v46, %s1173_s6 }
 0x634   : > { %694 = vrot.lane.b32.xlu0 %v685_v1, %s1173_s6 }
 0x635   : > { %v678_v48 = vpop.permute.xlu1 %677  ;;  %v647_v0 = vpop.permute.xlu0 %646 }
 0x636   : > { %v686_v49 = vmul.f32 %v678_v48, %v1264_v7 }
 0x638   : > { %696 = vrot.lane.b32.xlu1 %v686_v49, %s1173_s6 }
 0x639   : > { %v682_v2 = vpop.permute.xlu1 %681  ;;  %v662_v14 = vpop.permute.xlu0 %661 }
 0x63a   : > { %v687_v50 = vmul.f32 %v682_v2, %v1279_v11  ;;  %v667_v35 = vmul.f32 %v662_v14, %v1279_v11 }
 0x63c   : > { %698 = vrot.lane.b32.xlu0 %v687_v50, %s1173_s6  ;;  %s1109_s6 = scalar_lea.vmem %s1568_s29, 512 }
 0x63d   : > { %p1110_p11 = scmp.ne.s32.totalorder %s1568_s29, %s1109_s6  ;;  %p1117_p1 = scmp.lt.s32.totalorder %s1115_s9, %s1109_s6 }
 0x63e   : > { %v710_v51 = vpop.permute.xlu1 %709 }
 0x63f   : > { %v724_v52 = vmul.f32 %v710_v51, %v1415_v4  ;;  %p1111_p12 = pnand %p1110_p11, %p1240_p5  ;;  %p1118_p2 = por %p1117_p1, %p1116_p0 }
 0x641   : > { %732 = vrot.lane.b32.xlu1 %v724_v52, %s1171_s4  ;;  %p1112_p13 = pneg %p1111_p12 }
 0x642   : > { %v714_v53 = vpop.permute.xlu1 %713 }
 0x643   : > { %v725_v54 = vmul.f32 %v714_v53, %v1417_v13  ;;  %v664_v13 = vmul.f32 %v647_v0, %v1260_v5  ;;  %p1119_p3 = pnand %p1118_p2, %p1112_p13 }
 0x645   : > { %734 = vrot.lane.b32.xlu0 %v725_v54, %s1171_s4 }
 0x646   : > { %v718_v55 = vpop.permute.xlu1 %717 }
 0x647   : > { %v726_v56 = vmul.f32 %v718_v55, %v1423_v24  ;;  %v991_v24 = vld [vmem:[%s1617_s0 + $0x2] ss:$0 sm:$0xff] }
 0x649   : > { %736 = vrot.lane.b32.xlu1 %v726_v56, %s1171_s4 }
 0x64a   : > { %v722_v58 = vpop.permute.xlu1 %721 }
 0x64b   : > { %v727_v59 = vmul.f32 %v722_v58, %v1419_v21 }
 0x64d   : > { %738 = vrot.lane.b32.xlu0 %v727_v59, %s1171_s4 }
 0x64f   : > { %v652_v62 = vpop.permute.xlu1 %651 }
 0x650   : > { %v665_v21 = vmul.f32 %v652_v62, %v1262_v6 }
 0x653   : > { %v657_v4 = vpop.permute.xlu1 %656 }
 0x654   : > { %v666_v30 = vmul.f32 %v657_v4, %v1264_v7 }
 0x6a5   : > { %v693_v3 = vpop.permute.xlu1 %692 }
 0x6a6   : > { %v695_v17 = vpop.permute.xlu0 %694  ;;  %v704_v22 = vadd.f32 %v693_v3, %v664_v13 }
 0x6a7   : > { %v705_v27 = vadd.f32 %v695_v17, %v665_v21 }
 0x6aa   : > { %v697_v18 = vpop.permute.xlu1 %696 }
 0x6ab   : > { %v706_v32 = vadd.f32 %v697_v18, %v666_v30 }
 0x6ae   : > { %v699_v23 = vpop.permute.xlu0 %698 }
 0x6af   : > { %v707_v9 = vadd.f32 %v699_v23, %v667_v35 }
 0x6b3   : > { %v733_v25 = vpop.permute.xlu1 %732 }
 0x6b4   : > { %v1508_v26 = vadd.f32 %v733_v25, %v704_v22 }
 0x6b6   : > { %v752_v28 = vmul.f32 %v991_v24, %v1508_v26 }
 0x6b7   : > { %v735_v29 = vpop.permute.xlu0 %734 }
 0x6b8   : > { %v1512_v31 = vadd.f32 %v735_v29, %v705_v27  ;;  %v756_v5 = vsel %vm219_vm0, %v752_v28, 0.0 }
 0x6b9   : > { %757 = vadd.xlane.f32.xlu1 %v756_v5 }
 0x6ba   : > { %v753_v33 = vmul.f32 %v991_v24, %v1512_v31 }
 0x6bb   : > { %v737_v34 = vpop.permute.xlu1 %736 }
 0x6bc   : > { %v1517_v6 = vadd.f32 %v737_v34, %v706_v32  ;;  %v759_v36 = vsel %vm219_vm0, %v753_v33, 0.0 }
 0x6bd   : > { %760 = vadd.xlane.f32.xlu0 %v759_v36 }
 0x6be   : > { %v754_v8 = vmul.f32 %v991_v24, %v1517_v6 }
 0x6bf   : > { %v739_v7 = vpop.permute.xlu0 %738 }
 0x6c0   : > { %v1521_v37 = vadd.f32 %v739_v7, %v707_v9  ;;  %v762_v38 = vsel %vm219_vm0, %v754_v8, 0.0 }
 0x6c1   : > { %763 = vadd.xlane.f32.xlu0 %v762_v38 }
 0x6c2   : > { %v755_v12 = vmul.f32 %v991_v24, %v1521_v37 }
 0x6c4   : > { %v765_v39 = vsel %vm219_vm0, %v755_v12, 0.0 }
 0x6c5   : > { %766 = vadd.xlane.f32.xlu1 %v765_v39 }
 0x6d6   : > { %846 = vrot.lane.b32.xlu1 %v1465_v40, %s1178_s11 }
 0x6d7   : > { %844 = vrot.lane.b32.xlu0 %v1463_v20, %s1178_s11 }
 0x6da   : > { %848 = vrot.lane.b32.xlu1 %v1469_v42, %s1178_s11 }
 0x6db   : > { %850 = vrot.lane.b32.xlu0 %v1474_v44, %s1178_s11 }
 0x742   : > { %v758_v11 = vpop.xlane.xlu1 %757 }
 0x743   : > { %v768_v10 = vrot.slane %v758_v11, 4 }
 0x745   : > { %v769_v15 = vmax.f32 %v758_v11, %v768_v10 }
 0x746   : > { %v761_v16 = vpop.xlane.xlu0 %760 }
 0x747   : > { %v770_v19 = vrot.slane %v769_v15, 2  ;;  %v774_v41 = vrot.slane %v761_v16, 4 }
 0x749   : > { %v771_v43 = vmax.f32 %v769_v15, %v770_v19  ;;  %v775_v45 = vmax.f32 %v761_v16, %v774_v41 }
 0x74a   : > { %v764_v46 = vpop.xlane.xlu0 %763 }
 0x74b   : > { %v772_v47 = vrot.slane %v771_v43, 1  ;;  %v776_v1 = vrot.slane %v775_v45, 2  ;;  %v780_v48 = vrot.slane %v764_v46, 4 }
 0x74d   : > { %v773_v49 = vmax.f32 %v771_v43, %v772_v47  ;;  %v777_v40 = vmax.f32 %v775_v45, %v776_v1  ;;  %v781_v2 = vmax.f32 %v764_v46, %v780_v48 }
 0x74e   : > { %v767_v20 = vpop.xlane.xlu1 %766 }
 0x74f   : > { %v792_v50 = vsub.f32 %v758_v11, %v773_v49  ;;  %v778_v42 = vrot.slane %v777_v40, 1  ;;  %v782_v51 = vrot.slane %v781_v2, 2  ;;  %v786_v44 = vrot.slane %v767_v20, 4 }
 0x751   : > { %v796_v52 = vmul.f32 1.442695, %v792_v50  ;;  %v779_v53 = vmax.f32 %v777_v40, %v778_v42  ;;  %v783_v54 = vmax.f32 %v781_v2, %v782_v51  ;;  %v787_v55 = vmax.f32 %v767_v20, %v786_v44 }
 0x752   : > { %v847_v48 = vpop.permute.xlu1 %846 }
 0x753   : > { %1093 = vpow2.f32 %v796_v52  ;;  %v793_v56 = vsub.f32 %v761_v16, %v779_v53  ;;  %v784_v58 = vrot.slane %v783_v54, 1  ;;  %v788_v59 = vrot.slane %v787_v55, 2 }
 0x754   : > { %v857_v42 = vsel %vm363_vm4, %v1353_v61, %v847_v48 }
 0x755   : > { %v798_v62 = vmul.f32 1.442695, %v793_v56  ;;  %v785_v0 = vmax.f32 %v783_v54, %v784_v58  ;;  %v789_v4 = vmax.f32 %v787_v55, %v788_v59 }
 0x756   : > { %v849_v44 = vpop.permute.xlu1 %848 }
 0x757   : > { %1095 = vpow2.f32 %v798_v62  ;;  %v794_v3 = vsub.f32 %v764_v46, %v785_v0  ;;  %v790_v14 = vrot.slane %v789_v4, 1  ;;  %v845_v46 = vpop.permute.xlu0 %844  ;;  %v858_v53 = vsel %vm363_vm4, %v1351_v60, %v849_v44 }
 0x758   : > { %v856_v49 = vsel %vm363_vm4, %v1348_v57, %v845_v46 }
 0x759   : > { %v800_v17 = vmul.f32 1.442695, %v794_v3  ;;  %v791_v18 = vmax.f32 %v789_v4, %v790_v14 }
 0x75b   : > { %1097 = vpow2.f32 %v800_v17  ;;  %v795_v13 = vsub.f32 %v767_v20, %v791_v18  ;;  %v851_v55 = vpop.permute.xlu0 %850 }
 0x75c   : > { %v859_v58 = vsel %vm363_vm4, %v1357_v63, %v851_v55 }
 0x75d   : > { %v802_v22 = vmul.f32 1.442695, %v795_v13 }
 0x75f   : > { %1099 = vpow2.f32 %v802_v22 }
 0x760   : > { %v1094_v23 = vpop.eup %1093 }
 0x761   : > { %v804_v24 = vrot.slane %v1094_v23, 4 }
 0x763   : > { %v805_v25 = vadd.f32 %v1094_v23, %v804_v24 }
 0x764   : > { %v1096_v21 = vpop.eup %1095 }
 0x765   : > { %v806_v27 = vrot.slane %v805_v25, 2  ;;  %v810_v28 = vrot.slane %v1096_v21, 4 }
 0x767   : > { %v807_v29 = vadd.f32 %v806_v27, %v805_v25  ;;  %v811_v30 = vadd.f32 %v1096_v21, %v810_v28 }
 0x768   : > { %v1098_v5 = vpop.eup %1097 }
 0x769   : > { %v808_v32 = vrot.slane %v807_v29, 1  ;;  %v812_v33 = vrot.slane %v811_v30, 2  ;;  %v816_v34 = vrot.slane %v1098_v5, 4 }
 0x76b   : > { %v809_v35 = vadd.f32 %v808_v32, %v807_v29  ;;  %v813_v36 = vadd.f32 %v812_v33, %v811_v30  ;;  %v817_v9 = vadd.f32 %v1098_v5, %v816_v34 }
 0x76c   : > { %v1100_v8 = vpop.eup %1099 }
 0x76d   : > { %1101 = vrcp.f32 %v809_v35  ;;  %v814_v7 = vrot.slane %v813_v36, 1  ;;  %v818_v38 = vrot.slane %v817_v9, 2  ;;  %v822_v12 = vrot.slane %v1100_v8, 4 }
 0x76f   : > { %v815_v39 = vadd.f32 %v814_v7, %v813_v36  ;;  %v819_v11 = vadd.f32 %v818_v38, %v817_v9  ;;  %v823_v10 = vadd.f32 %v1100_v8, %v822_v12 }
 0x771   : > { %1103 = vrcp.f32 %v815_v39  ;;  %v820_v15 = vrot.slane %v819_v11, 1  ;;  %v824_v16 = vrot.slane %v823_v10, 2 }
 0x773   : > { %v821_v19 = vadd.f32 %v820_v15, %v819_v11  ;;  %v825_v41 = vadd.f32 %v824_v16, %v823_v10 }
 0x775   : > { %1105 = vrcp.f32 %v821_v19  ;;  %v826_v43 = vrot.slane %v825_v41, 1 }
 0x777   : > { %v827_v45 = vadd.f32 %v826_v43, %v825_v41 }
 0x779   : > { %1107 = vrcp.f32 %v827_v45 }
 0x77a   : > { %v1102_v47 = vpop.eup %1101 }
 0x77b   : > { %v829_v1 = vmul.f32 %v1102_v47, %v1094_v23 }
 0x77d   : > { %v836_v40 = vmul.f32 %v829_v1, %v1508_v26  ;;  %v861_v2 = vsel %vm860_vm5, %v856_v49, %v829_v1 }
 0x77e   : > { %v1104_v20 = vpop.eup %1103  ;;  %866 = vst.msk [vmem:[%s1537_s27] sm:$0xff] %vm865_vm6, %v861_v2 }
 0x77f   : > { %840 = vst.msk [vmem:[%s167_s24] sm:$0xff] %vm219_vm0, %v836_v40  ;;  %v831_v50 = vmul.f32 %v1104_v20, %v1096_v21 }
 0x781   : > { %v837_v51 = vmul.f32 %v831_v50, %v1512_v31  ;;  %v862_v57 = vsel %vm860_vm5, %v857_v42, %v831_v50 }
 0x782   : > { %v1106_v26 = vpop.eup %1105  ;;  %867 = vst.msk [vmem:[%s1537_s27 + $0x8] sm:$0xff] %vm865_vm6, %v862_v57 }
 0x783   : > { %841 = vst.msk [vmem:[%s167_s24 + $0x8] sm:$0xff] %vm219_vm0, %v837_v51  ;;  %v833_v52 = vmul.f32 %v1106_v26, %v1098_v5 }
 0x785   : > { %v838_v54 = vmul.f32 %v833_v52, %v1517_v6  ;;  %v863_v61 = vsel %vm860_vm5, %v858_v53, %v833_v52 }
 0x786   : > { %868 = vst.msk [vmem:[%s1537_s27 + $0x10] sm:$0xff] %vm865_vm6, %v863_v61  ;;  %v1108_v31 = vpop.eup %1107 }
 0x787   : > { %842 = vst.msk [vmem:[%s167_s24 + $0x10] sm:$0xff] %vm219_vm0, %v838_v54  ;;  %v835_v56 = vmul.f32 %v1108_v31, %v1100_v8 }
 0x789   : > { %v839_v60 = vmul.f32 %v835_v56, %v1521_v37  ;;  %v864_v6 = vsel %vm860_vm5, %v859_v58, %v835_v56 }
 0x78a   : > { %869 = vst.msk [vmem:[%s1537_s27 + $0x18] sm:$0xff] %vm865_vm6, %v864_v6 }
 0x78b   : > { %843 = vst.msk [vmem:[%s167_s24 + $0x18] sm:$0xff] %vm219_vm0, %v839_v60 }
 0x78c   : > { %1122 = shalt.err (!%p1119_p3)
}
 0x78d   : > { %s1123_s10 = scalar_lea.hbm %s1566_s5, 512  ;;  %s1127_s19 = scalar_lea.hbm %s1619_s2, 1024 }
 0x78e   : > { %p1124_p4 = scmp.ne.s32.totalorder %s1566_s5, %s1123_s10  ;;  %p1128_p9 = scmp.lt.s32.totalorder %s1566_s5, %s1619_s2 }
 0x78f   : > { %p1129_p10 = scmp.lt.s32.totalorder %s1127_s19, %s1123_s10 }
 0x790   : > { %p1125_p7 = pnand %p1124_p4, %p1240_p5 }
 0x791   : > { %p1130_p11 = por %p1129_p10, %p1128_p9 }
 0x792   : > { %p1126_p8 = pneg %p1125_p7 }
 0x794   : > { %p1131_p12 = pnand %p1130_p11, %p1126_p8 }
 0x796   : > { %1134 = shalt.err (!%p1131_p12)
}
 0x797   : > { %s1180_s26 = smov 128   ;;  %s1181_s27 = smov 8  }
 0x798   : > { %999 = dma.vmem_to_hbm [thread:$0]  (%p1240_p5), %s1568_s29, 512, %s1566_s5, %s1577_s16, %s1180_s26, %s1180_s26, %s1181_s27  }
 0x799 PF: > { %p1005_p13 = scmp.ge.s32.totalorder %s1169_s15, 2  ;;  %s908_s24 = sand.u32 1, %s1157_s12  }
 0x79a   : > { %s909_s28 = scalar_lea.sflag [#allocation3], %s908_s24 }
 0x79b   : > { %p1002_p0 = pnand %p1005_p13, %p1244_p6 }
 0x79d   : > { %p1003_p1 = pneg %p1002_p0 }
 0x79f   : > { %1152 = dma.done.wait (%p1003_p1), %s909_s28, 512  }
 0x7a0   : > { %1154 = vsyncadd (%p1003_p1), %s909_s28, 4294966784  ;;  %p14_p2 = scmp.ge.s32.totalorder %s1227_s18, 4   ;;  %s1623_s12 = smov %s1161_s13 }
 0x7a1   : > { %s1624_s13 = smov %s1165_s14  ;;  %s1625_s14 = smov %s1238_s21 }
 0x7a2   : > { %s1626_s15 = smov %s1227_s18  ;;  %16 = sbr.rel (!%p14_p2) target bundleno = 3 (0x3), region = 75 }
 0x7a7   :  { %922 = vsyncpa [#allocation3], 1 }
 0x7a8   :  { %924 = vsyncpa [#allocation3 + $0x1], 1 }

</bundles_post_ra>
